<compile_context>
chip_gen: v7x
topology: tpu7x:2x2x1
jax: 0.10.0
libtpu: 0.0.40
codegen_flags: <defaults>
</compile_context>

<pallas_src>
import jax
import jax.numpy as jnp
from jax.experimental import pallas as pl
from jax.experimental.pallas import tpu as pltpu


def _build_pe(d_model: int, max_len: int = 5000, dtype=jnp.float32) -> jnp.ndarray:
    """Deterministic sinusoidal table, same recipe as the PyTorch __init__.

    Returns shape (max_len, 1, d_model).
    """
    if d_model % 2 != 0:
        # The PyTorch reference also shape-mismatches on the cos assignment for
        # odd d_model, so only even d_model is supported.
        raise ValueError("d_model must be even")
    position = jnp.arange(0, max_len, dtype=jnp.float32)[:, None]           # (max_len, 1)
    div_term = jnp.exp(
        jnp.arange(0, d_model, 2, dtype=jnp.float32) * (-jnp.log(10000.0) / d_model)
    )                                                                        # (d_model//2,)
    angles = position * div_term                                             # (max_len, d_model//2)
    pe = jnp.zeros((max_len, d_model), dtype=jnp.float32)
    pe = pe.at[:, 0::2].set(jnp.sin(angles))
    pe = pe.at[:, 1::2].set(jnp.cos(angles))
    # unsqueeze(0).transpose(0, 1) -> (max_len, 1, d_model)
    return pe[:, None, :].astype(dtype)


def _add_pe_kernel(x_ref, pe_ref, o_ref):
    # x_ref/o_ref: (tS, tB, D) VMEM tiles; pe_ref: dense (tS, D) VMEM tile.
    # Elementwise add with broadcast over the batch (sublane) axis — VPU only.
    o_ref[...] = x_ref[...] + pe_ref[...][:, None, :]


def _sublane_quantum(dtype) -> int:
    """Native sublane packing quantum: 8 for f32, 16 for bf16, 32 for int8/fp8."""
    return max(8, 32 // jnp.dtype(dtype).itemsize)


def _choose_tiles(S, B, D, dtype, target_bytes):
    """Pick (tile_seq, tile_batch) so one x block is ~target_bytes."""
    itemsize = jnp.dtype(dtype).itemsize
    sub = _sublane_quantum(dtype)
    row_bytes = D * itemsize                           # one (seq, batch-element) row

    # Batch tile (sublane axis): full batch if it fits the budget or is below
    # the sublane quantum; otherwise split to a multiple of the quantum (the
    # boundary block is simply padded).
    if B * row_bytes <= target_bytes or B <= sub:
        tB = B
    else:
        tB = (target_bytes // row_bytes) // sub * sub
        tB = max(sub, min(B, tB))

    # Seq tile (leading axis): fill the remaining budget; keep it a multiple
    # of 8 so the dense pe tile (sublane = tS) needs no padding.
    tS = max(1, min(S, target_bytes // max(1, tB * row_bytes)))
    if tS >= 8:
        tS -= tS % 8

    # v7x megacore: guarantee >= 2 grid steps along a "parallel" axis so the
    # second TensorCore is never idle (no-op on single-TC v5e/v6e).
    if pl.cdiv(S, tS) * pl.cdiv(B, tB) < 2:
        if S >= 2:
            tS = pl.cdiv(S, 2)
        elif B > sub:
            tB = max(sub, (pl.cdiv(B, 2) + sub - 1) // sub * sub)
    return tS, tB


def positional_encoding_forward(x: jnp.ndarray, pe: jnp.ndarray, *,
                                tile_seq: int | None = None,
                                tile_batch: int | None = None,
                                target_block_bytes: int = 6 * 1024 * 1024,
                                donate_x: bool = False) -> jnp.ndarray:
    """x: (seq, batch, d_model); pe: (max_len, 1, d_model) or (max_len, d_model).

    Returns x + pe[:seq] (broadcast over batch). Set donate_x=True only when
    the caller actually donates x's buffer (e.g. jit donate_argnums); otherwise
    XLA would insert a defensive copy that costs more bandwidth than it saves.
    """
    S, B, D = x.shape
    if pe.ndim == 3:
        assert pe.shape[1] == 1, "pe must be (max_len, 1, d_model)"
        pe = pe.reshape(pe.shape[0], pe.shape[2])      # free metadata reshape
    max_len, D_pe = pe.shape
    assert S <= max_len and D_pe == D
    if pe.dtype != x.dtype:
        # Perf: casting here would re-read the whole table in HBM every call.
        raise ValueError(
            f"pe dtype {pe.dtype} != x dtype {x.dtype}; bake the table in the "
            "serving dtype once at init (see _build_pe(dtype=...)).")

    itemsize = jnp.dtype(x.dtype).itemsize
    tS_auto, tB_auto = _choose_tiles(S, B, D, x.dtype, target_block_bytes)
    tS = max(1, min(S, tile_seq if tile_seq is not None else tS_auto))
    tB = max(1, min(B, tile_batch if tile_batch is not None else tB_auto))

    grid = (pl.cdiv(S, tS), pl.cdiv(B, tB))

    # Live VMEM ~= double-buffered x in + x out + pe tile; request it explicitly
    # so the per-generation scoped default (16/32 MiB) never rejects big tiles,
    # while staying comfortably under v7x's 64 MiB physical VMEM.
    x_block_bytes = tS * tB * D * itemsize
    pe_block_bytes = max(8, tS) * D * itemsize
    needed = 4 * x_block_bytes + 2 * pe_block_bytes + (2 << 20)
    vmem_limit = int(min(56 << 20, max(32 << 20, needed)))

    # NOTE: d_model that is a multiple of 128 keeps the output lane-dense
    # (unmasked vst); odd widths still work, just with masked partial stores.

    return pl.pallas_call(
        _add_pe_kernel,
        out_shape=jax.ShapeDtypeStruct((S, B, D), x.dtype),
        grid=grid,
        in_specs=[
            # x tiles over (seq, batch); d_model stays whole (lane axis).
            pl.BlockSpec((tS, tB, D), lambda i, j: (i, j, 0)),
            # Dense 2-D pe window; block index constant along the batch grid
            # axis so the same pe tile is reused for every batch tile.
            pl.BlockSpec((tS, D), lambda i, j: (i, 0)),
        ],
        out_specs=pl.BlockSpec((tS, tB, D), lambda i, j: (i, j, 0)),
        input_output_aliases=({0: 0} if donate_x else {}),
        compiler_params=pltpu.CompilerParams(
            dimension_semantics=("parallel", "parallel"),
            vmem_limit_bytes=vmem_limit),
    )(x, pe)


if __name__ == "__main__":
    # Small but vreg-friendly shapes: batch=8 fills the sublanes, d_model=128
    # fills the lanes (dense, unmasked stores); seq=16 stays tiny.
    SEQ, BATCH, D_MODEL, MAX_LEN = 16, 8, 128, 128

    key = jax.random.PRNGKey(0)
    x = jax.random.normal(key, (SEQ, BATCH, D_MODEL), dtype=jnp.float32)
    pe = _build_pe(D_MODEL, max_len=MAX_LEN, dtype=jnp.float32)

    # Reference (same math as the PyTorch forward), computed up-front.
    ref = x + pe[:SEQ, :]

    # Auto tiling: the megacore guard splits the seq axis into 2 blocks even at
    # this tiny size, so the pipelined multi-step path is exercised.
    out = positional_encoding_forward(x, pe)
    out = jax.block_until_ready(out)

    assert out.shape == (SEQ, BATCH, D_MODEL)
    assert jnp.allclose(out, ref, atol=1e-6, rtol=1e-6)

    print("KERNEL_OK")
</pallas_src>

<mosaic_0001>
module attributes {stable_mosaic.version = 11 : i64} {
  func.func @_add_pe_kernel(%arg0: i32, %arg1: i32, %arg2: memref<8x8x128xf32, #tpu.memory_space<vmem>>, %arg3: memref<8x128xf32, #tpu.memory_space<vmem>>, %arg4: memref<8x8x128xf32, #tpu.memory_space<vmem>>) attributes {dimension_semantics = [#tpu.dimension_semantics<parallel>, #tpu.dimension_semantics<parallel>], iteration_bounds = array<i64: 2, 1>, scalar_prefetch = 0 : i64, scratch_operands = 0 : i64, tpu.core_type = #tpu.core_type<tc>, window_params = [{transform_indices = @transform_0, window_bounds = array<i64: 8, 8, 128>}, {transform_indices = @transform_1, window_bounds = array<i64: 8, 128>}, {transform_indices = @transform_2, window_bounds = array<i64: 8, 8, 128>}]} {
    %c0 = arith.constant 0 : index
    %c0_0 = arith.constant 0 : index
    %c0_1 = arith.constant 0 : index
    %0 = vector.load %arg2[%c0, %c0_0, %c0_1] : memref<8x8x128xf32, #tpu.memory_space<vmem>>, vector<8x8x128xf32>
    %c0_2 = arith.constant 0 : index
    %c0_3 = arith.constant 0 : index
    %1 = vector.load %arg3[%c0_2, %c0_3] : memref<8x128xf32, #tpu.memory_space<vmem>>, vector<8x128xf32>
    %2 = vector.shape_cast %1 : vector<8x128xf32> to vector<8x1x128xf32>
    %3 = vector.broadcast %2 : vector<8x1x128xf32> to vector<8x8x128xf32>
    %4 = arith.addf %0, %3 : vector<8x8x128xf32>
    %c0_4 = arith.constant 0 : index
    %c0_5 = arith.constant 0 : index
    %c0_6 = arith.constant 0 : index
    %5 = vector.load %arg4[%c0_4, %c0_5, %c0_6] : memref<8x8x128xf32, #tpu.memory_space<vmem>>, vector<8x8x128xf32>
    tpu.vector_store %arg4[%c0_4, %c0_5, %c0_6], %4 {strides = array<i32>} : memref<8x8x128xf32, #tpu.memory_space<vmem>>, vector<8x8x128xf32>,
    return
  }
  func.func @transform_0(%arg0: i32, %arg1: i32) -> (i32, i32, i32) {
    %c0_i32 = arith.constant 0 : i32
    %c0_i32_0 = arith.constant 0 : i32
    return %arg0, %arg1, %c0_i32 : i32, i32, i32
  }
  func.func @transform_1(%arg0: i32, %arg1: i32) -> (i32, i32) {
    %c0_i32 = arith.constant 0 : i32
    %c0_i32_0 = arith.constant 0 : i32
    return %arg0, %c0_i32 : i32, i32
  }
  func.func @transform_2(%arg0: i32, %arg1: i32) -> (i32, i32, i32) {
    %c0_i32 = arith.constant 0 : i32
    %c0_i32_0 = arith.constant 0 : i32
    return %arg0, %arg1, %c0_i32 : i32, i32, i32
  }
}

</mosaic_0001>

<bundles_post_ra>
// kernel: tpu_custom_call.1
= control target key start
LH: loop header
LB: loop body
LE: loop exit
PB: predicated region body
PF: predicated region fallthrough
CT: control target
= control target key end

     0   :  { %7 = vsyncpa [#allocation3], 0  ;;  %s951_s0 = inlined_call_operand.hbm [shape: f32[16,8,128], index: 0, kind: input, shape index: {}]   ;;  %s952_s1 = inlined_call_operand.hbm [shape: f32[128,128], index: 1, kind: input, shape index: {}]   ;;  %s953_s2 = inlined_call_operand.hbm [shape: f32[16,8,128], index: 2, kind: output, shape index: {}]  }
   0x1   :  { %9 = vsyncpa [#allocation3 + $0x1], 0 }
   0x2   :  { %10 = vsyncpa [#allocation6], 0 }
   0x3   :  { %12 = vsyncpa [#allocation6 + $0x1], 0 }
   0x4   :  { %13 = vsyncpa [#allocation4], 0 }
   0x5   :  { %15 = vsyncpa [#allocation4 + $0x1], 0  ;;  %s720_s9 = smov 0   ;;  %s722_s10 = smov 0  }
   0x6   :  { %s724_s11 = smov 0   ;;  %s726_s12 = smov 0  }
   0x7   :  { %s728_s13 = smov 0   ;;  %s730_s14 = smov 0  }
   0x8 LB: > { %s456_s15 = sadd.s32 4294967295, %s695_s14   ;;  %s457_s16 = sadd.s32 4294967294, %s695_s14   ;;  %s695_s14 = sphi %s730_s14, %s21_s14   ;;  %s691_s13 = sphi %s728_s13, %s972_s13   ;;  %s687_s12 = sphi %s726_s12, %s971_s12   ;;  %s683_s11 = sphi %s724_s11, %s970_s11   ;;  %s679_s10 = sphi %s722_s10, %s969_s10   ;;  %s675_s9 = sphi %s720_s9, %s968_s9  }
   0x9   : > { %s33_s17 = sadd.s32 1, %s691_s13  ;;  %s42_s18 = sadd.s32 1, %s683_s11 }
   0xa   : > { %p35_p0 = scmp.ge.s32.totalorder %s33_s17, 2  ;;  %p49_p1 = scmp.ne.s32.totalorder %s683_s11, %s679_s10 }
   0xb   : > { %p50_p2 = scmp.eq.s32.totalorder %s695_s14, 0  ;;  %p55_p3 = scmp.ne.s32.totalorder %s679_s10, %s675_s9 }
   0xc   : > { %s974_s17 = smov (%p35_p0, %s33_s17), 0  ;;  %p56_p5 = scmp.eq.s32.totalorder %s456_s15, 0 }
   0xd   : > { %p761_p4 = por %p50_p2, %p49_p1  ;;  %s37_s20 = ssub.s32 %s691_s13, %s974_s17 }
   0xe   : > { %p107_p6 = scmp.eq.s32.totalorder %s456_s15, 1  ;;  %p40_p7 = scmp.eq.s32.totalorder %s37_s20, 0 }
   0xf   : > { %p767_p8 = por %p56_p5, %p55_p3  ;;  %p113_p10 = scmp.eq.s32.totalorder %s457_s16, 1 }
  0x10   : > { %p771_p9 = por %p107_p6, %p49_p1  ;;  %p493_p13 = scmp.lt.s32.totalorder %s695_s14, 2 }
  0x11   : > { %s957_s21 = scalar_select %p767_p8, 1, 0 }
  0x12   : > { %s958_s22 = scalar_select %p771_p9, 1, 0 }
  0x13   : > { %s776_s23 = scalar_select %p40_p7, %s683_s11, %s42_s18  }
  0x14   : > { %p778_p11 = por %p113_p10, %p55_p3  ;;  %s785_s25 = sand.u32 1, %s683_s11  }
  0x15   : > { %s460_s26 = sshll.u32 %s785_s25, 6  ;;  %s474_s27 = sshll.u32 %s691_s13, 10 }
  0x16   : > { %s959_s24 = scalar_select %p778_p11, 1, 0 }
  0x17   : > { %s792_s30 = scalar_lea.hbm %s951_s0, %s474_s27  ;;  %s137_s3 = scalar_lea.vmem [#allocation2], %s460_s26 }
  0x18   : > { %s145_s4 = sshll.u32 %s137_s3, 4  ;;  %p798_p0 = pnand %p493_p13, %p761_p4  ;;  %s794_s4 = int_to_ptr.vmem [resolvable:$true] %s145_s4 }
  0x19   : > { %s134_s6 = scalar_lea.sflag [#allocation3], %s785_s25  ;;  %s549_s7 = scalar_lea.hbm %s792_s30, 1024 }
  0x1a   : > { %p550_p2 = scmp.ne.s32.totalorder %s792_s30, %s549_s7  ;;  %p551_p3 = pneg %p798_p0 }
  0x1b   : > { %s554_s16 = scalar_lea.hbm %s951_s0, 2048  ;;  %p555_p4 = scmp.lt.u32.totalorder %s792_s30, %s951_s0 }
  0x1c   : > { %p552_p5 = pnand %p551_p3, %p550_p2  ;;  %p556_p7 = scmp.lt.u32.totalorder %s554_s16, %s549_s7 }
  0x1d   : > { %p558_p13 = scmp.lt.u32.totalorder %s549_s7, %s792_s30 }
  0x1e   : > { %p553_p6 = pneg %p552_p5  ;;  %p557_p10 = por %p556_p7, %p555_p4 }
  0x20   : > { %p559_p12 = por %p558_p13, %p557_p10 }
  0x22   : > { %p560_p1 = pnand %p559_p12, %p553_p6 }
  0x24   : > { %563 = shalt.err (!%p560_p1)
}
  0x25   : > { %s564_s20 = scalar_lea.vmem %s794_s4, 1024  ;;  %s697_s26 = smov [#allocation2]  }
  0x26   : > { %p565_p2 = scmp.ne.s32.totalorder %s794_s4, %s564_s20  ;;  %s569_s27 = sshll.u32 %s697_s26, 4  ;;  %s570_s27 = int_to_ptr.vmem [resolvable:$false] %s569_s27 }
  0x27   : > { %s571_s28 = scalar_lea.vmem %s570_s27, 2048  ;;  %p572_p9 = scmp.lt.s32.totalorder %s794_s4, %s570_s27 }
  0x28   : > { %p567_p5 = pnand %p565_p2, %p551_p3  ;;  %p573_p4 = scmp.lt.s32.totalorder %s571_s28, %s564_s20 }
  0x2a   : > { %p568_p11 = pneg %p567_p5  ;;  %p574_p7 = por %p573_p4, %p572_p9 }
  0x2c   : > { %p575_p10 = pnand %p574_p7, %p568_p11 }
  0x2e   : > { %578 = shalt.err (!%p575_p10)
}
  0x2f   : > { %s698_s29 = smov 128   ;;  %s699_s3 = smov 8  }
  0x30   : > { %485 = dma.hbm_to_vmem [thread:$0]  (!%p798_p0), %s792_s30, 1024, %s794_s4, %s134_s6, %s698_s29, %s698_s29, %s699_s3  }
  0x31   : > { %p171_p12 = scmp.lt.s32.totalorder %s695_s14, 3  ;;  %s463_s7 = sshll.u32 %s785_s25, 3 }
  0x32   : > { %s464_s8 = sshll.u32 %s691_s13, 7  ;;  %p961_p9 = scmp.ge.s32.totalorder %s695_s14, 1 }
  0x33   : > { %s843_s19 = scalar_lea.hbm %s952_s1, %s464_s8  ;;  %s159_s20 = scalar_lea.vmem [#allocation5], %s463_s7 }
  0x34   : > { %p836_p11 = pnand %p961_p9, %p171_p12  ;;  %s166_s26 = sshll.u32 %s159_s20, 4  ;;  %s167_s26 = int_to_ptr.vmem [resolvable:$true] %s166_s26 }
  0x35   : > { %s156_s30 = scalar_lea.sflag [#allocation6], %s785_s25  ;;  %s579_s4 = scalar_lea.hbm %s843_s19, 128 }
  0x36   : > { %s962_s15 = scalar_select %p836_p11, 1, 0 }
  0x37   : > { %p580_p1 = scmp.ne.s32.totalorder %s843_s19, %s579_s4  ;;  %s584_s28 = scalar_lea.hbm %s952_s1, 2048 }
  0x38   : > { %p585_p2 = scmp.lt.u32.totalorder %s843_s19, %s952_s1  ;;  %p586_p5 = scmp.lt.u32.totalorder %s584_s28, %s579_s4 }
  0x39   : > { %p582_p6 = pnand %p580_p1, %p551_p3  ;;  %p588_p7 = scmp.lt.u32.totalorder %s579_s4, %s843_s19 }
  0x3a   : > { %p587_p4 = por %p586_p5, %p585_p2 }
  0x3b   : > { %p583_p13 = pneg %p582_p6 }
  0x3c   : > { %p589_p10 = por %p588_p7, %p587_p4 }
  0x3e   : > { %p590_p12 = pnand %p589_p10, %p583_p13 }
  0x40   : > { %593 = shalt.err (!%p590_p12)
}
  0x41   : > { %s594_s25 = scalar_lea.vmem %s167_s26, 128  ;;  %s700_s7 = smov [#allocation5]  }
  0x42   : > { %p595_p9 = scmp.ne.s32.totalorder %s167_s26, %s594_s25  ;;  %s599_s8 = sshll.u32 %s700_s7, 4  ;;  %s600_s8 = int_to_ptr.vmem [resolvable:$false] %s599_s8 }
  0x43   : > { %s601_s16 = scalar_lea.vmem %s600_s8, 256  ;;  %p602_p8 = scmp.lt.s32.totalorder %s167_s26, %s600_s8 }
  0x44   : > { %p597_p1 = pnand %p595_p9, %p551_p3  ;;  %p603_p11 = scmp.lt.s32.totalorder %s601_s16, %s594_s25 }
  0x46   : > { %p598_p6 = pneg %p597_p1  ;;  %p604_p2 = por %p603_p11, %p602_p8 }
  0x48   : > { %p605_p5 = pnand %p604_p2, %p598_p6 }
  0x4a   : > { %608 = shalt.err (!%p605_p5)
}
  0x4b   : > { %488 = dma.hbm_to_vmem [thread:$0]  (!%p798_p0), %s843_s19, 128, %s167_s26, %s156_s30  }
  0x4c   : > { %p963_p13 = scmp.ne.s32.totalorder %s962_s15, 0 }
  0x4d   : > { %s868_s18 = sand.u32 (!%p963_p13), 1, %s679_s10   ;;  %p964_p8 = scmp.ne.s32.totalorder (!%p963_p13), %s957_s21, 0 }
  0x4e   : > { %175 = sbr.rel (%p963_p13) target bundleno = 124 (0x7c), region = 28  ;;  %s466_s20 = sshll.u32 (!%p963_p13), %s868_s18, 6 }
  0x4f   : > { %s178_s4 = scalar_lea.sflag (!%p963_p13), [#allocation3], %s868_s18  ;;  %s874_s6 = scalar_lea.vmem (!%p963_p13), [#allocation2], %s466_s20 }
  0x55   : > { %662 = dma.done.wait (%p964_p8), %s178_s4, 1024  }
  0x56   : > { %664 = vsyncadd (%p964_p8), %s178_s4, 4294966272  ;;  %s467_s5 = sshll.u32 %s868_s18, 3  ;;  %s187_s15 = scalar_lea.sflag [#allocation6], %s868_s18 }
  0x57   : > { %s190_s19 = scalar_lea.vmem [#allocation5], %s467_s5 }
  0x58   : > { %666 = dma.done.wait (%p964_p8), %s187_s15, 128  }
  0x59   : > { %668 = vsyncadd (%p964_p8), %s187_s15, 4294967168  ;;  %v232_v0 = vlaneseq  ;;  %v701_v1 = vmov 1966171168   ;;  %v226_v6 = vld [vmem:[%s190_s19] sm:$0xff]  ;;  %v220_v19 = vld [vmem:[%s874_s6 + $0x10] sm:$0xff]  ;;  %s215_s21 = scalar_lea.vmem [#allocation7], %s466_s20 }
  0x5a   : > { %v230_v2 = vunpack.c.l.s4 %v701_v1  ;;  %v228_v9 = vcombine.high %v226_v6, %v226_v6  ;;  %v218_v13 = vld [vmem:[%s874_s6] sm:$0xff]  ;;  %v219_v18 = vld [vmem:[%s874_s6 + $0x8] sm:$0xff]  ;;  %v221_v26 = vld [vmem:[%s874_s6 + $0x18] sm:$0xff]  ;;  %s348_s26 = sshll.u32 %s215_s21, 4  ;;  %s475_s30 = sshll.u32 %s687_s12, 10  ;;  %s897_s26 = int_to_ptr.vmem [resolvable:$true] %s348_s26 }
  0x5b   : > { %v233_v3 = vshrl.u32 %v232_v0, 7  ;;  %v222_v25 = vld [vmem:[%s874_s6 + $0x20] sm:$0xff]  ;;  %v223_v33 = vld [vmem:[%s874_s6 + $0x28] sm:$0xff]  ;;  %v224_v34 = vld [vmem:[%s874_s6 + $0x30] sm:$0xff]  ;;  %s902_s12 = scalar_lea.hbm %s953_s2, %s475_s30  ;;  %s334_s29 = scalar_lea.sflag [#allocation4], %s868_s18 }
  0x5c   : > { %v231_v4 = vunpack.c.0.s8 %v230_v2  ;;  %v225_v40 = vld [vmem:[%s874_s6 + $0x38] sm:$0xff]  ;;  %s609_s3 = scalar_lea.vmem %s897_s26, 1024  ;;  %p965_p3 = scmp.ne.s32.totalorder %s958_s22, 0 }
  0x5d   : > { %v279_v8 = vsub.s32 0, %v233_v3  ;;  %p610_p0 = scmp.ne.s32.totalorder %s897_s26, %s609_s3  ;;  %s702_s25 = smov [#allocation7]  }
  0x5e   : > { %v234_v5 = vsub.s32 %v231_v4, %v233_v3  ;;  %s613_s7 = sshll.u32 %s702_s25, 4  ;;  %s614_s7 = int_to_ptr.vmem [resolvable:$false] %s613_s7 }
  0x5f   : > { %p611_p11 = pnand %p610_p0, %p965_p3  ;;  %s615_s8 = scalar_lea.vmem %s614_s7, 2048 }
  0x60   : > { %v235_v7 = vrot.slane %v226_v6, %v234_v5  ;;  %v242_v12 = vrot.slane %v228_v9, %v234_v5  ;;  %p616_p7 = scmp.lt.s32.totalorder %s897_s26, %s614_s7  ;;  %p617_p10 = scmp.lt.s32.totalorder %s615_s8, %s609_s3 }
  0x61   : > { %p612_p4 = pneg %p611_p11 }
  0x62   : > { %v251_v10 = vrot.slane %v235_v7, %v234_v5  ;;  %v243_v11 = vcombine.high %v235_v7, %v235_v7  ;;  %v258_v17 = vrot.slane %v242_v12, %v234_v5  ;;  %v244_v20 = vcombine.high %v242_v12, %v242_v12  ;;  %p618_p12 = por %p617_p10, %p616_p7 }
  0x64   : > { %v280_v14 = vrot.slane %v251_v10, %v279_v8  ;;  %v265_v15 = vrot.slane %v243_v11, %v234_v5  ;;  %v273_v16 = vcombine.high %v251_v10, %v251_v10  ;;  %v296_v27 = vrot.slane %v258_v17, %v279_v8  ;;  %p619_p9 = pnand %p618_p12, %p612_p4 }
  0x65   : > { %v272_v28 = vrot.slane %v244_v20, %v234_v5  ;;  %v274_v29 = vcombine.high %v258_v17, %v258_v17 }
  0x66   : > { %v317_v21 = vadd.f32 %v280_v14, %v218_v13  ;;  %v284_v22 = vrot.slane %v265_v15, %v279_v8  ;;  %v288_v23 = vrot.slane %v273_v16, %v279_v8  ;;  %v275_v24 = vcombine.high %v265_v15, %v265_v15 }
  0x67   : > { %v321_v35 = vadd.f32 %v296_v27, %v222_v25  ;;  %v300_v36 = vrot.slane %v272_v28, %v279_v8  ;;  %v304_v37 = vrot.slane %v274_v29, %v279_v8  ;;  %v276_v38 = vcombine.high %v272_v28, %v272_v28 }
  0x68   : > { %325 = vst [vmem:[%s215_s21] sm:$0xff] %v317_v21  ;;  %v318_v30 = vadd.f32 %v284_v22, %v219_v18  ;;  %v319_v31 = vadd.f32 %v288_v23, %v220_v19  ;;  %v292_v32 = vrot.slane %v275_v24, %v279_v8 }
  0x69   : > { %329 = vst [vmem:[%s215_s21 + $0x20] sm:$0xff] %v321_v35  ;;  %v322_v41 = vadd.f32 %v300_v36, %v223_v33  ;;  %v323_v42 = vadd.f32 %v304_v37, %v224_v34  ;;  %v308_v43 = vrot.slane %v276_v38, %v279_v8 }
  0x6a   : > { %326 = vst [vmem:[%s215_s21 + $0x8] sm:$0xff] %v318_v30  ;;  %327 = vst [vmem:[%s215_s21 + $0x10] sm:$0xff] %v319_v31  ;;  %v320_v39 = vadd.f32 %v292_v32, %v221_v26 }
  0x6b   : > { %330 = vst [vmem:[%s215_s21 + $0x28] sm:$0xff] %v322_v41  ;;  %331 = vst [vmem:[%s215_s21 + $0x30] sm:$0xff] %v323_v42  ;;  %v324_v44 = vadd.f32 %v308_v43, %v225_v40 }
  0x6c   : > { %328 = vst [vmem:[%s215_s21 + $0x18] sm:$0xff] %v320_v39 }
  0x6d   : > { %332 = vst [vmem:[%s215_s21 + $0x38] sm:$0xff] %v324_v44 }
  0x6e   : > { %622 = shalt.err (!%p619_p9)
}
  0x6f   : > { %s623_s16 = scalar_lea.hbm %s902_s12, 1024  ;;  %s627_s6 = scalar_lea.hbm %s953_s2, 2048 }
  0x70   : > { %p624_p1 = scmp.ne.s32.totalorder %s902_s12, %s623_s16  ;;  %p628_p5 = scmp.lt.u32.totalorder %s902_s12, %s953_s2 }
  0x71   : > { %p629_p13 = scmp.lt.u32.totalorder %s627_s6, %s623_s16  ;;  %p631_p0 = scmp.lt.u32.totalorder %s623_s16, %s902_s12 }
  0x72   : > { %p625_p6 = pnand %p624_p1, %p965_p3 }
  0x73   : > { %p630_p8 = por %p629_p13, %p628_p5 }
  0x74   : > { %p626_p2 = pneg %p625_p6 }
  0x75   : > { %p632_p11 = por %p631_p0, %p630_p8 }
  0x77   : > { %p633_p4 = pnand %p632_p11, %p626_p2 }
  0x79   : > { %636 = shalt.err (!%p633_p4)
}
  0x7a   : > { %s703_s19 = smov 128   ;;  %s704_s21 = smov 8  }
  0x7b   : > { %480 = dma.vmem_to_hbm [thread:$0]  (%p965_p3), %s897_s26, 1024, %s902_s12, %s334_s29, %s703_s19, %s703_s19, %s704_s21  }
  0x7c PF: > { %s363_s30 = sand.u32 1, %s675_s9   ;;  %p966_p7 = scmp.ne.s32.totalorder %s959_s24, 0 }
  0x7d   : > { %p967_p10 = scmp.ge.s32.totalorder %s695_s14, 2  ;;  %s364_s27 = scalar_lea.sflag [#allocation4], %s363_s30 }
  0x7f   : > { %p490_p12 = pnand %p967_p10, %p966_p7 }
  0x81   : > { %670 = dma.done.wait (!%p490_p12), %s364_s27, 1024  }
  0x82   : > { %672 = vsyncadd (!%p490_p12), %s364_s27, 4294966272  ;;  %s21_s14 = sadd.s32 1, %s695_s14   ;;  %s968_s9 = smov %s679_s10 }
  0x83   : > { %p18_p9 = scmp.ge.s32.totalorder %s21_s14, 4   ;;  %s969_s10 = smov %s683_s11 }
  0x84   : > { %s970_s11 = smov %s776_s23  ;;  %s971_s12 = smov %s691_s13 }
  0x85   : > { %s972_s13 = smov %s974_s17  ;;  %20 = sbr.rel (!%p18_p9) target bundleno = 8 (0x8), region = 86 }
  0x8c   :  { %369 = vsyncpa [#allocation3], 1 }
  0x8d   :  { %371 = vsyncpa [#allocation3 + $0x1], 1 }
  0x8e   :  { %372 = vsyncpa [#allocation6], 1 }
  0x8f   :  { %374 = vsyncpa [#allocation6 + $0x1], 1 }
  0x90   :  { %375 = vsyncpa [#allocation4], 1 }
  0x91   :  { %377 = vsyncpa [#allocation4 + $0x1], 1 }

</bundles_post_ra>
